<compile_context>
chip_gen: v7x
topology: tpu7x:2x2x1
jax: 0.10.0
libtpu: 0.0.40
codegen_flags: <defaults>
</compile_context>

<pallas_src>
import functools

import jax
import jax.numpy as jnp
from jax import lax
from jax.experimental import pallas as pl
from jax.experimental.pallas import tpu as pltpu


def _recon_loss_kernel(inputs_ref, baseline_ref, targets_ref, out_ref,
                       kl_acc, ce_acc, *, alpha, n_valid):
    pid = pl.program_id(0)

    @pl.when(pid == 0)
    def _():
        kl_acc[...] = jnp.zeros_like(kl_acc)
        ce_acc[...] = jnp.zeros_like(ce_acc)

    x = inputs_ref[...].astype(jnp.float32)    # (TILE_N, C) log-probs / logits
    b = baseline_ref[...].astype(jnp.float32)  # (TILE_N, C) target probabilities
    t = targets_ref[...]                       # (TILE_N, 1) int32 class indices

    tile_n, c = x.shape

    # Row-validity mask (handles padding when N is not a multiple of TILE_N).
    row_ids = pid * tile_n + lax.broadcasted_iota(jnp.int32, (tile_n, 1), 0)
    row_valid = row_ids < n_valid                              # (TILE_N, 1)

    # --- KLDivLoss partial sum: b * (log(b) - x), 0 where b == 0 -------------
    pos = jnp.logical_and(b > 0.0, row_valid)                  # (TILE_N, C)
    log_b = jnp.log(jnp.where(pos, b, 1.0))
    kl_terms = jnp.where(pos, b * (log_b - x), 0.0)
    kl_acc[...] += jnp.sum(kl_terms, keepdims=True)            # (1, 1)

    # --- CrossEntropy partial sum: logsumexp(x) - x[n, t[n]] -----------------
    m = jnp.max(x, axis=-1, keepdims=True)                     # (TILE_N, 1)
    lse = m + jnp.log(jnp.sum(jnp.exp(x - m), axis=-1, keepdims=True))
    col_ids = lax.broadcasted_iota(jnp.int32, (tile_n, c), 1)
    picked = jnp.sum(jnp.where(col_ids == t, x, 0.0), axis=-1, keepdims=True)
    ce_rows = jnp.where(row_valid, lse - picked, 0.0)           # (TILE_N, 1)
    ce_acc[...] += jnp.sum(ce_rows, keepdims=True)              # (1, 1)

    # --- Finalize on the last row tile ---------------------------------------
    @pl.when(pid == pl.num_programs(0) - 1)
    def _():
        inv_n = jnp.float32(1.0 / n_valid)
        out_ref[...] = (ce_acc[...] + jnp.float32(alpha) * kl_acc[...]) * inv_n


def _choose_tile_n(n, c, itemsize):
    """Largest row tile (multiple of 8, <=512) whose double-buffered footprint
    for the two (TILE_N, C) inputs stays well under the 32 MiB scoped VMEM
    default (safe on v5e/v6e/v7x)."""
    budget_bytes = 20 * 1024 * 1024
    per_row = 2 * 2 * c * itemsize          # 2 inputs x 2 pipeline buffers
    tile = budget_bytes // max(per_row, 1)
    tile = max(8, min(512, int(tile)))
    tile = (tile // 8) * 8
    n_pad8 = ((n + 7) // 8) * 8
    return max(8, min(tile, n_pad8))


def reconstruction_loss(inputs, baseline, targets, alpha=0.1, tile_n=None):
    """inputs: (N, C) float, baseline: (N, C) float, targets: (N,) int.
    Returns scalar f32 loss = CE(inputs, targets) + alpha * KL_batchmean(inputs, baseline)."""
    n, c = inputs.shape
    if tile_n is None:
        tile_n = _choose_tile_n(n, c, jnp.dtype(inputs.dtype).itemsize)
    num_tiles = -(-n // tile_n)
    n_pad = num_tiles * tile_n
    pad = n_pad - n
    if pad:
        # Padded rows: baseline=0 -> KL term 0; CE term masked out in-kernel.
        inputs = jnp.pad(inputs, ((0, pad), (0, 0)))
        baseline = jnp.pad(baseline, ((0, pad), (0, 0)))
        targets = jnp.pad(targets, ((0, pad),))
    targets2d = targets.astype(jnp.int32).reshape(n_pad, 1)

    kernel = functools.partial(_recon_loss_kernel, alpha=float(alpha), n_valid=n)

    out = pl.pallas_call(
        kernel,
        out_shape=jax.ShapeDtypeStruct((1, 1), jnp.float32),
        grid_spec=pltpu.PrefetchScalarGridSpec(
            num_scalar_prefetch=0,
            grid=(num_tiles,),
            in_specs=[
                pl.BlockSpec((tile_n, c), lambda i: (i, 0)),
                pl.BlockSpec((tile_n, c), lambda i: (i, 0)),
                pl.BlockSpec((tile_n, 1), lambda i: (i, 0)),
            ],
            out_specs=pl.BlockSpec((1, 1), lambda i: (0, 0)),
            scratch_shapes=[
                pltpu.VMEM((1, 1), jnp.float32),   # KL partial-sum accumulator
                pltpu.VMEM((1, 1), jnp.float32),   # CE partial-sum accumulator
            ],
        ),
        compiler_params=pltpu.CompilerParams(
            dimension_semantics=("arbitrary",),    # reduction axis (accumulator)
            vmem_limit_bytes=32 * 1024 * 1024,
        ),
    )(inputs, baseline, targets2d)
    return out[0, 0]


def _reference_loss(inputs, baseline, targets, alpha=0.1):
    inputs = inputs.astype(jnp.float32)
    baseline = baseline.astype(jnp.float32)
    n = inputs.shape[0]
    pos = baseline > 0.0
    kl_terms = jnp.where(pos, baseline * (jnp.log(jnp.where(pos, baseline, 1.0)) - inputs), 0.0)
    kl = jnp.sum(kl_terms) / n
    logp = jax.nn.log_softmax(inputs, axis=-1)
    ce = -jnp.mean(logp[jnp.arange(n), targets])
    return ce + alpha * kl


if __name__ == "__main__":
    key = jax.random.PRNGKey(0)

    # --- Case 1: small canonical shape (batch=8, classes=32) -----------------
    k1, k2, k3 = jax.random.split(key, 3)
    N, C = 8, 32
    # inputs: log-probabilities (KLDivLoss 'input'); CrossEntropyLoss treats the
    # same tensor as logits, exactly as in the PyTorch module.
    inputs = jax.nn.log_softmax(jax.random.normal(k1, (N, C), dtype=jnp.float32), axis=-1)
    baseline = jax.nn.softmax(jax.random.normal(k2, (N, C), dtype=jnp.float32), axis=-1)
    targets = jax.random.randint(k3, (N,), 0, C, dtype=jnp.int32)

    loss = jax.block_until_ready(reconstruction_loss(inputs, baseline, targets, alpha=0.1))
    ref = _reference_loss(inputs, baseline, targets, alpha=0.1)
    assert jnp.allclose(loss, ref, rtol=1e-5, atol=1e-5), (loss, ref)

    # --- Case 2: multi-tile + padding path (N not a multiple of the tile) ----
    k4, k5, k6 = jax.random.split(jax.random.PRNGKey(1), 3)
    N2, C2 = 21, 160
    inputs2 = jax.nn.log_softmax(jax.random.normal(k4, (N2, C2), dtype=jnp.float32), axis=-1)
    baseline2 = jax.nn.softmax(jax.random.normal(k5, (N2, C2), dtype=jnp.float32), axis=-1)
    targets2 = jax.random.randint(k6, (N2,), 0, C2, dtype=jnp.int32)

    loss2 = jax.block_until_ready(
        reconstruction_loss(inputs2, baseline2, targets2, alpha=0.1, tile_n=8))
    ref2 = _reference_loss(inputs2, baseline2, targets2, alpha=0.1)
    assert jnp.allclose(loss2, ref2, rtol=1e-5, atol=1e-5), (loss2, ref2)

    print("KERNEL_OK")
</pallas_src>

<mosaic_0001>
module attributes {stable_mosaic.version = 11 : i64} {
  func.func @_recon_loss_kernel(%arg0: i32, %arg1: memref<8x32xf32, #tpu.memory_space<vmem>>, %arg2: memref<8x32xf32, #tpu.memory_space<vmem>>, %arg3: memref<8x1xi32, #tpu.memory_space<vmem>>, %arg4: memref<1x1xf32, #tpu.memory_space<vmem>>, %arg5: memref<1x1xf32, #tpu.memory_space<vmem>>, %arg6: memref<1x1xf32, #tpu.memory_space<vmem>>) attributes {dimension_semantics = [#tpu.dimension_semantics<arbitrary>], iteration_bounds = array<i64: 1>, scalar_prefetch = 0 : i64, scratch_operands = 2 : i64, tpu.core_type = #tpu.core_type<tc>, window_params = [{transform_indices = @transform_0, window_bounds = array<i64: 8, 32>}, {transform_indices = @transform_1, window_bounds = array<i64: 8, 32>}, {transform_indices = @transform_2, window_bounds = array<i64: 8, 1>}, {pipeline_mode = #tpu.pipeline_mode<synchronous>, transform_indices = @transform_3, window_bounds = array<i64: 1, 1>}]} {
    %c0_i32 = arith.constant 0 : i32
    %0 = arith.cmpi eq, %arg0, %c0_i32 : i32
    %1 = arith.extui %0 : i1 to i32
    %c0_i32_0 = arith.constant 0 : i32
    %2 = arith.cmpi ne, %1, %c0_i32_0 : i32
    scf.if %2 {
      %cst_26 = arith.constant 0.000000e+00 : f32
      %61 = vector.broadcast %cst_26 : f32 to vector<1x1xf32>
      %c0_27 = arith.constant 0 : index
      %c0_28 = arith.constant 0 : index
      %62 = vector.load %arg5[%c0_27, %c0_28] : memref<1x1xf32, #tpu.memory_space<vmem>>, vector<1x1xf32>
      tpu.vector_store %arg5[%c0_27, %c0_28], %61 {strides = array<i32>} : memref<1x1xf32, #tpu.memory_space<vmem>>, vector<1x1xf32>,
      %cst_29 = arith.constant 0.000000e+00 : f32
      %63 = vector.broadcast %cst_29 : f32 to vector<1x1xf32>
      %c0_30 = arith.constant 0 : index
      %c0_31 = arith.constant 0 : index
      %64 = vector.load %arg6[%c0_30, %c0_31] : memref<1x1xf32, #tpu.memory_space<vmem>>, vector<1x1xf32>
      tpu.vector_store %arg6[%c0_30, %c0_31], %63 {strides = array<i32>} : memref<1x1xf32, #tpu.memory_space<vmem>>, vector<1x1xf32>,
    } else {
    }
    %c0 = arith.constant 0 : index
    %c0_1 = arith.constant 0 : index
    %3 = vector.load %arg1[%c0, %c0_1] : memref<8x32xf32, #tpu.memory_space<vmem>>, vector<8x32xf32>
    %c0_2 = arith.constant 0 : index
    %c0_3 = arith.constant 0 : index
    %4 = vector.load %arg2[%c0_2, %c0_3] : memref<8x32xf32, #tpu.memory_space<vmem>>, vector<8x32xf32>
    %c0_4 = arith.constant 0 : index
    %c0_5 = arith.constant 0 : index
    %5 = vector.load %arg3[%c0_4, %c0_5] : memref<8x1xi32, #tpu.memory_space<vmem>>, vector<8x1xi32>
    %c8_i32 = arith.constant 8 : i32
    %6 = arith.muli %arg0, %c8_i32 : i32
    %7 = tpu.iota {dimensions = array<i32: 0>} : vector<8x1xi32>
    %8 = vector.broadcast %6 : i32 to vector<8x1xi32>
    %9 = arith.addi %8, %7 : vector<8x1xi32>
    %c8_i32_6 = arith.constant 8 : i32
    %10 = vector.broadcast %c8_i32_6 : i32 to vector<8x1xi32>
    %11 = arith.cmpi slt, %9, %10 : vector<8x1xi32>
    %cst = arith.constant 0.000000e+00 : f32
    %12 = vector.broadcast %cst : f32 to vector<8x32xf32>
    %13 = arith.cmpf ogt, %4, %12 : vector<8x32xf32>
    %14 = vector.broadcast %11 : vector<8x1xi1> to vector<8x32xi1>
    %15 = arith.andi %13, %14 : vector<8x32xi1>
    %cst_7 = arith.constant 1.000000e+00 : f32
    %16 = vector.broadcast %cst_7 : f32 to vector<8x32xf32>
    %17 = arith.select %15, %4, %16 : vector<8x32xi1>, vector<8x32xf32>
    %18 = math.log %17 : vector<8x32xf32>
    %19 = arith.subf %18, %3 : vector<8x32xf32>
    %20 = arith.mulf %4, %19 : vector<8x32xf32>
    %cst_8 = arith.constant 0.000000e+00 : f32
    %21 = vector.broadcast %cst_8 : f32 to vector<8x32xf32>
    %22 = arith.select %15, %20, %21 : vector<8x32xi1>, vector<8x32xf32>
    %c0_9 = arith.constant 0 : index
    %c0_10 = arith.constant 0 : index
    %23 = vector.load %arg5[%c0_9, %c0_10] : memref<1x1xf32, #tpu.memory_space<vmem>>, vector<1x1xf32>
    %24 = vector.shape_cast %22 : vector<8x32xf32> to vector<1x8x32xf32>
    %cst_11 = arith.constant dense<0.000000e+00> : vector<1xf32>
    %25 = vector.multi_reduction <add>, %24, %cst_11 [1, 2] : vector<1x8x32xf32> to vector<1xf32>
    %26 = vector.shape_cast %25 : vector<1xf32> to vector<1x1x1xf32>
    %27 = vector.extract %26[0, 0, 0] : f32 from vector<1x1x1xf32>
    %28 = vector.broadcast %27 : f32 to vector<1x1xf32>
    %29 = arith.addf %23, %28 : vector<1x1xf32>
    %c0_12 = arith.constant 0 : index
    %c0_13 = arith.constant 0 : index
    %30 = vector.load %arg5[%c0_12, %c0_13] : memref<1x1xf32, #tpu.memory_space<vmem>>, vector<1x1xf32>
    tpu.vector_store %arg5[%c0_12, %c0_13], %29 {strides = array<i32>} : memref<1x1xf32, #tpu.memory_space<vmem>>, vector<1x1xf32>,
    %cst_14 = arith.constant dense<0xFF800000> : vector<8xf32>
    %31 = vector.multi_reduction <maximumf>, %3, %cst_14 [1] : vector<8x32xf32> to vector<8xf32>
    %32 = vector.shape_cast %31 : vector<8xf32> to vector<8x1xf32>
    %33 = vector.broadcast %32 : vector<8x1xf32> to vector<8x32xf32>
    %34 = arith.subf %3, %33 : vector<8x32xf32>
    %35 = math.exp %34 : vector<8x32xf32>
    %cst_15 = arith.constant dense<0.000000e+00> : vector<8xf32>
    %36 = vector.multi_reduction <add>, %35, %cst_15 [1] : vector<8x32xf32> to vector<8xf32>
    %37 = vector.shape_cast %36 : vector<8xf32> to vector<8x1xf32>
    %38 = math.log %37 : vector<8x1xf32>
    %39 = arith.addf %32, %38 : vector<8x1xf32>
    %40 = tpu.iota {dimensions = array<i32: 1>} : vector<8x32xi32>
    %41 = vector.broadcast %5 : vector<8x1xi32> to vector<8x32xi32>
    %42 = arith.cmpi eq, %40, %41 : vector<8x32xi32>
    %cst_16 = arith.constant 0.000000e+00 : f32
    %43 = vector.broadcast %cst_16 : f32 to vector<8x32xf32>
    %44 = arith.select %42, %3, %43 : vector<8x32xi1>, vector<8x32xf32>
    %cst_17 = arith.constant dense<0.000000e+00> : vector<8xf32>
    %45 = vector.multi_reduction <add>, %44, %cst_17 [1] : vector<8x32xf32> to vector<8xf32>
    %46 = vector.shape_cast %45 : vector<8xf32> to vector<8x1xf32>
    %47 = arith.subf %39, %46 : vector<8x1xf32>
    %cst_18 = arith.constant 0.000000e+00 : f32
    %48 = vector.broadcast %cst_18 : f32 to vector<8x1xf32>
    %49 = arith.select %11, %47, %48 : vector<8x1xi1>, vector<8x1xf32>
    %c0_19 = arith.constant 0 : index
    %c0_20 = arith.constant 0 : index
    %50 = vector.load %arg6[%c0_19, %c0_20] : memref<1x1xf32, #tpu.memory_space<vmem>>, vector<1x1xf32>
    %51 = vector.shape_cast %49 : vector<8x1xf32> to vector<1x8x1xf32>
    %cst_21 = arith.constant dense<0.000000e+00> : vector<1xf32>
    %52 = vector.multi_reduction <add>, %51, %cst_21 [1, 2] : vector<1x8x1xf32> to vector<1xf32>
    %53 = vector.shape_cast %52 : vector<1xf32> to vector<1x1x1xf32>
    %54 = vector.extract %53[0, 0, 0] : f32 from vector<1x1x1xf32>
    %55 = vector.broadcast %54 : f32 to vector<1x1xf32>
    %56 = arith.addf %50, %55 : vector<1x1xf32>
    %c0_22 = arith.constant 0 : index
    %c0_23 = arith.constant 0 : index
    %57 = vector.load %arg6[%c0_22, %c0_23] : memref<1x1xf32, #tpu.memory_space<vmem>>, vector<1x1xf32>
    tpu.vector_store %arg6[%c0_22, %c0_23], %56 {strides = array<i32>} : memref<1x1xf32, #tpu.memory_space<vmem>>, vector<1x1xf32>,
    %c0_i32_24 = arith.constant 0 : i32
    %58 = arith.cmpi eq, %arg0, %c0_i32_24 : i32
    %59 = arith.extui %58 : i1 to i32
    %c0_i32_25 = arith.constant 0 : i32
    %60 = arith.cmpi ne, %59, %c0_i32_25 : i32
    scf.if %60 {
      %c0_26 = arith.constant 0 : index
      %c0_27 = arith.constant 0 : index
      %61 = vector.load %arg6[%c0_26, %c0_27] : memref<1x1xf32, #tpu.memory_space<vmem>>, vector<1x1xf32>
      %c0_28 = arith.constant 0 : index
      %c0_29 = arith.constant 0 : index
      %62 = vector.load %arg5[%c0_28, %c0_29] : memref<1x1xf32, #tpu.memory_space<vmem>>, vector<1x1xf32>
      %cst_30 = arith.constant 1.000000e-01 : f32
      %63 = vector.broadcast %cst_30 : f32 to vector<1x1xf32>
      %64 = arith.mulf %63, %62 : vector<1x1xf32>
      %65 = arith.addf %61, %64 : vector<1x1xf32>
      %cst_31 = arith.constant 1.250000e-01 : f32
      %66 = vector.broadcast %cst_31 : f32 to vector<1x1xf32>
      %67 = arith.mulf %65, %66 : vector<1x1xf32>
      %c0_32 = arith.constant 0 : index
      %c0_33 = arith.constant 0 : index
      %68 = vector.load %arg4[%c0_32, %c0_33] : memref<1x1xf32, #tpu.memory_space<vmem>>, vector<1x1xf32>
      tpu.vector_store %arg4[%c0_32, %c0_33], %67 {strides = array<i32>} : memref<1x1xf32, #tpu.memory_space<vmem>>, vector<1x1xf32>,
    } else {
    }
    return
  }
  func.func @transform_0(%arg0: i32) -> (i32, i32) {
    %c0_i32 = arith.constant 0 : i32
    %c0_i32_0 = arith.constant 0 : i32
    return %arg0, %c0_i32 : i32, i32
  }
  func.func @transform_1(%arg0: i32) -> (i32, i32) {
    %c0_i32 = arith.constant 0 : i32
    %c0_i32_0 = arith.constant 0 : i32
    return %arg0, %c0_i32 : i32, i32
  }
  func.func @transform_2(%arg0: i32) -> (i32, i32) {
    %c0_i32 = arith.constant 0 : i32
    %c0_i32_0 = arith.constant 0 : i32
    return %arg0, %c0_i32 : i32, i32
  }
  func.func @transform_3(%arg0: i32) -> (i32, i32) {
    %c0_i32 = arith.constant 0 : i32
    %c0_i32_0 = arith.constant 0 : i32
    %c0_i32_1 = arith.constant 0 : i32
    return %c0_i32, %c0_i32_0 : i32, i32
  }
}

</mosaic_0001>

<bundles_post_ra>
// kernel: tpu_custom_call.1
= control target key start
LH: loop header
LB: loop body
LE: loop exit
PB: predicated region body
PF: predicated region fallthrough
CT: control target
= control target key end

     0   :  { %8 = vsyncpa [#allocation5], 0  ;;  %s258_s0 = inlined_call_operand.vmem [shape: f32[8,32], index: 0, kind: input, shape index: {}]   ;;  %s259_s1 = inlined_call_operand.hbm [shape: f32[8,32], index: 1, kind: input, shape index: {}]   ;;  %s260_s2 = inlined_call_operand.vmem [shape: s32[8,1], index: 2, kind: input, shape index: {}]   ;;  %s261_s3 = inlined_call_operand.hbm [shape: f32[1,1], index: 3, kind: output, shape index: {}]  }
   0x1   :  { %9 = vsyncpa [#allocation6], 0  ;;  %s195_s12 = smov [#allocation4]   ;;  %s147_s16 = scalar_lea.hbm %s259_s1, 128 }
   0x2   :  { %s18_s13 = sshll.u32 %s195_s12, 4  ;;  %p148_p0 = scmp.ne.s32.totalorder %s259_s1, %s147_s16  ;;  %s19_s13 = int_to_ptr.vmem [resolvable:$true] %s18_s13 }
   0x3   :  { %p151_p1 = scmp.lt.u32.totalorder %s147_s16, %s259_s1 }
   0x5   :  { %p153_p2 = pnand %p151_p1, %p148_p0 }
   0x7   :  { %156 = shalt.err (!%p153_p2)
}
   0x8   :  { %s157_s21 = scalar_lea.vmem %s19_s13, 128  ;;  %p162_p4 = scmp.lt.s32.totalorder %s19_s13, %s19_s13 }
   0x9   :  { %p158_p3 = scmp.ne.s32.totalorder %s19_s13, %s157_s21  ;;  %p163_p5 = scmp.lt.s32.totalorder %s157_s21, %s157_s21 }
   0xb   :  { %p164_p6 = por %p163_p5, %p162_p4 }
   0xd   :  { %p165_p7 = pnand %p164_p6, %p158_p3 }
   0xf   :  { %168 = shalt.err (!%p165_p7)
}
  0x10   :  { %21 = dma.hbm_to_vmem [thread:$0]  %s259_s1, 128, %s19_s13, [#allocation5]  }
  0x11   :  { %191 = dma.done.wait [#allocation5], 128  }
  0x12   :  { %192 = vsyncadd [#allocation5], 4294967168  ;;  %v196_v0 = vmov 0   ;;  %vm54_vm0 = vcmask 261120   ;;  %v34_v1 = vld [vmem:[%s258_s0] sm:$0xff]  ;;  %v81_v7 = vlaneseq  ;;  %vm94_vm3 = vcmask 7168  }
  0x13   :  { %140 = vset.pattern.permute.xlu0 %v196_v0  ;;  %v69_v2 = vsel %vm54_vm0, %v34_v1, -inf  ;;  %v36_v3 = vld [vmem:[%s260_s2] sm:$0xff]  ;;  %vm31_vm4 = vcmask 0   ;;  %v197_v36 = vmov 0.0   ;;  %s198_s2 = smov [#allocation7]  }
  0x14   :  { %70 = vmax.xlane.f32.xlu0 %v69_v2  ;;  %v82_v8 = vand.u32 127, %v81_v7  ;;  %v35_v13 = vld [vmem:[#allocation4] sm:$0xff]  ;;  %32 = vst.msk [vmem:[#allocation2] sm:$0x1] %vm31_vm4, %v197_v36  ;;  %33 = vst.msk [vmem:[#allocation3] sm:$0x1] %vm31_vm4, %v197_v36 }
  0x15   :  { %vm43_vm2 = vcmp.gt.f32.partialorder %v35_v13, 0.0  ;;  %s123_s28 = sshll.u32 %s198_s2, 4  ;;  %s124_s28 = int_to_ptr.vmem [resolvable:$true] %s123_s28 }
  0x16   :  { %v47_v15 = vsel %vm43_vm2, %v35_v13, 1.0  ;;  %s169_s29 = scalar_lea.vmem %s124_s28, 16  ;;  %s173_s30 = scalar_lea.vmem %s124_s28, 32 }
  0x17   :  { %p170_p8 = scmp.ne.s32.totalorder %s124_s28, %s169_s29  ;;  %p174_p9 = scmp.lt.s32.totalorder %s124_s28, %s124_s28 }
  0x18   :  { %p175_p10 = scmp.lt.s32.totalorder %s173_s30, %s169_s29 }
  0x1a   :  { %p176_p11 = por %p175_p10, %p174_p9 }
  0x1b   :  { %v53_v37 = vld [vmem:[#allocation2] sm:$0x1]  ;;  %v93_v47 = vld [vmem:[#allocation3] sm:$0x1] }
  0x1c   :  { %p177_p12 = pnand %p176_p11, %p170_p8 }
  0x2a   :  { %84 = vperm.xlu0 %140, %v36_v3  }
  0xa1   :  { %v71_v4 = vpop.xlane.xlu0 %70 }
  0xa2   :  { %v72_v5 = vsub.f32 %v34_v1, %v71_v4 }
  0xa4   :  { %v73_v6 = vmul.f32 1.442695, %v72_v5 }
  0xa6   :  { %141 = vpow2.f32 %v73_v6 }
  0xa7   :  { %143 = vlog2.f32 %v47_v15 }
  0xa9   :  { %v85_v9 = vpop.permute.xlu0 %84 }
  0xaa   :  { %vm86_vm1 = vcmp.eq.s32.totalorder %v82_v8, %v85_v9 }
  0xab   :  { %v87_v11 = vsel %vm86_vm1, %v34_v1, 0.0 }
  0xac   :  { %v88_v14 = vsel %vm54_vm0, %v87_v11, 0.0 }
  0xb0   :  { %v142_v10 = vpop.eup %141 }
  0xb1   :  { %v75_v12 = vsel %vm54_vm0, %v142_v10, 0.0  ;;  %v144_v16 = vpop.eup %143 }
  0xb2   :  { %76 = vadd.xlane.f32.xlu1 %v75_v12  ;;  %v49_v17 = vmul.f32 0.6931472, %v144_v16 }
  0xb4   :  { %v50_v18 = vsub.f32 %v49_v17, %v34_v1 }
  0xb6   :  { %89 = vadd.xlane.f32.xlu1 %v88_v14  ;;  %v51_v19 = vmul.f32 %v50_v18, %v35_v13 }
  0xb8   :  { %v52_v20 = vsel %vm43_vm2, %v51_v19, 0.0 }
  0xb9   :  { %v55_v21 = vsel %vm54_vm0, %v52_v20, 0.0 }
  0xba   :  { %56 = vadd.xlane.f32.xlu1 %v55_v21 }
 0x13f   :  { %v77_v22 = vpop.xlane.xlu1 %76 }
 0x140   :  { %145 = vlog2.f32 %v77_v22 }
 0x143   :  { %v90_v25 = vpop.xlane.xlu1 %89 }
 0x147   :  { %v57_v29 = vpop.xlane.xlu1 %56 }
 0x148   :  { %v58_v30 = vrot.slane %v57_v29, 4 }
 0x14a   :  { %v146_v23 = vpop.eup %145  ;;  %v59_v31 = vadd.f32 %v58_v30, %v57_v29 }
 0x14b   :  { %v79_v24 = vmul.f32 0.6931472, %v146_v23 }
 0x14c   :  { %v60_v32 = vrot.slane %v59_v31, 2 }
 0x14d   :  { %v80_v26 = vadd.f32 %v79_v24, %v71_v4 }
 0x14e   :  { %v61_v33 = vadd.f32 %v60_v32, %v59_v31 }
 0x14f   :  { %v91_v27 = vsub.f32 %v80_v26, %v90_v25 }
 0x150   :  { %v62_v34 = vrot.slane %v61_v33, 1 }
 0x151   :  { %v95_v28 = vsel %vm94_vm3, %v91_v27, 0.0 }
 0x152   :  { %96 = vadd.xlane.f32.xlu1 %v95_v28  ;;  %v63_v35 = vadd.f32 %v62_v34, %v61_v33 }
 0x154   :  { %132 = vpush %v63_v35 }
 0x185   :  { %s133_s0 = spop %132 }
 0x186   :  { %v65_v38 = vstv %s133_s0 }
 0x187   :  { %v66_v39 = vadd.f32 %v65_v38, %v53_v37 }
 0x189   :  { %68 = vst.msk [vmem:[#allocation2] sm:$0x1] %vm31_vm4, %v66_v39 }
 0x190   :  { %v112_v50 = vld [vmem:[#allocation2] sm:$0x1] }
 0x191   :  { %v113_v51 = vmul.f32 0.1, %v112_v50 }
 0x1df   :  { %v97_v40 = vpop.xlane.xlu1 %96 }
 0x1e0   :  { %v98_v41 = vrot.slane %v97_v40, 4 }
 0x1e2   :  { %v99_v42 = vadd.f32 %v98_v41, %v97_v40 }
 0x1e4   :  { %v100_v43 = vrot.slane %v99_v42, 2 }
 0x1e6   :  { %v101_v44 = vadd.f32 %v100_v43, %v99_v42 }
 0x1e8   :  { %v102_v45 = vrot.slane %v101_v44, 1 }
 0x1ea   :  { %v103_v46 = vadd.f32 %v102_v45, %v101_v44 }
 0x1ec   :  { %134 = vpush %v103_v46 }
 0x21d   :  { %s135_s1 = spop %134 }
 0x21e   :  { %v105_v48 = vstv %s135_s1 }
 0x21f   :  { %v106_v49 = vadd.f32 %v105_v48, %v93_v47 }
 0x221   :  { %107 = vst.msk [vmem:[#allocation3] sm:$0x1] %vm31_vm4, %v106_v49 }
 0x228   :  { %v111_v52 = vld [vmem:[#allocation3] sm:$0x1] }
 0x229   :  { %v114_v53 = vadd.f32 %v113_v51, %v111_v52 }
 0x22b   :  { %v115_v54 = vmul.f32 0.125, %v114_v53 }
 0x22d   :  { %116 = vst.msk [vmem:[#allocation7] sm:$0x1] %vm31_vm4, %v115_v54 }
 0x22e   :  { %180 = shalt.err (!%p177_p12)
}
 0x22f   :  { %s181_s6 = scalar_lea.hbm %s261_s3, 16 }
 0x230   :  { %p182_p13 = scmp.ne.s32.totalorder %s261_s3, %s181_s6  ;;  %p185_p0 = scmp.lt.u32.totalorder %s181_s6, %s261_s3 }
 0x232   :  { %p187_p1 = pnand %p185_p0, %p182_p13 }
 0x234   :  { %190 = shalt.err (!%p187_p1)
}
 0x235   :  { %126 = dma.vmem_to_hbm [thread:$0]  %s124_s28, 16, %s261_s3, [#allocation6]  }
 0x236   :  { %193 = dma.done.wait [#allocation6], 16  }
 0x237   :  { %194 = vsyncadd [#allocation6], 4294967280 }
 0x238   :  { %130 = vsyncpa [#allocation5], 1 }
 0x239   :  { %131 = vsyncpa [#allocation6], 1 }

</bundles_post_ra>
